<compile_context>
chip_gen: v7x
topology: tpu7x:2x2x1
jax: 0.10.0
libtpu: 0.0.40
codegen_flags: <defaults>
</compile_context>

<pallas_src>
import math

import jax
import jax.numpy as jnp
from jax import lax
from jax.experimental import pallas as pl
from jax.experimental.pallas import tpu as pltpu

_SQRT2 = 1.4142135623730951
_LANES = 128
_MAX_ROW_BLOCK = 2048   # (2048,128) f32: 4 MiB of blocks/step, 8 MiB double-buffered
_MIN_ROW_BLOCK = 512    # keep per-step overhead (~0.35us) small
_TARGET_STEPS = 8       # enough grid steps for pipelining + both v7x TCs


def _erf(v):
    """float32 erf, Abramowitz & Stegun 7.1.26 (analytic |err| <= 1.5e-7).

    Pushes exp() and the reciprocal onto the EUP (vrcp + one Newton step):
    ~20 VALU ops + 2 EUP ops per element vs ~30-35 VALU ops + a divide for the
    lax.erf rational-polynomial lowering.
    """
    av = jnp.abs(v)
    d = jnp.float32(1.0) + jnp.float32(0.3275911) * av
    t = pl.reciprocal(d, approx=True)
    t = t * (jnp.float32(2.0) - d * t)                     # one Newton step
    poly = jnp.float32(0.254829592) + t * (
        jnp.float32(-0.284496736) + t * (
            jnp.float32(1.421413741) + t * (
                jnp.float32(-1.453152027) + t * jnp.float32(1.061405429))))
    r = jnp.float32(1.0) - poly * t * jnp.exp(-(av * av))  # exp on the EUP
    return jnp.where(v < jnp.float32(0.0), -r, r)


def _entropy_kernel(x_ref, p_ref, o_ref):
    # x_ref: (row_blk, 128); p_ref: (2, row_blk, 128): plane0=mean, plane1=scale.
    x = x_ref[...].astype(jnp.float32)
    mean = p_ref[0].astype(jnp.float32)
    scale = p_ref[1].astype(jnp.float32)

    # scale[scale == 0] = 1e-9  (only exact zeros are patched, matching torch)
    scale = jnp.where(scale == 0.0, jnp.float32(1e-9), scale)

    # inv = 1 / (scale * sqrt(2)): approx vrcp (EUP) + one Newton step.
    d = scale * jnp.float32(_SQRT2)
    inv = pl.reciprocal(d, approx=True)
    inv = inv * (jnp.float32(2.0) - d * inv)

    z = (x - mean) * inv
    h = jnp.float32(0.5) * inv

    # cdf(x+0.5) - cdf(x-0.5) == 0.5 * (erf(z+h) - erf(z-h))
    # (abs kept to match torch.abs exactly, e.g. if a negative scale sneaks in)
    like = jnp.float32(0.5) * jnp.abs(_erf(z + h) - _erf(z - h))

    # Low_bound.apply forward: clamp(min=1e-6)
    o_ref[...] = jnp.maximum(like, jnp.float32(1e-6)).astype(o_ref.dtype)


def _pick_row_block(R, B):
    """Rows per block: >= ~_TARGET_STEPS grid steps when possible, >= 512 rows,
    <= 2048 rows, sublane-tile aligned (multiple of 16 covers f32 and bf16)."""
    want_blocks = max(1, -(-_TARGET_STEPS // B))     # ceil(TARGET / B)
    blk = -(-R // want_blocks)                       # ceil(R / want_blocks)
    blk = max(_MIN_ROW_BLOCK, min(_MAX_ROW_BLOCK, blk))
    if blk >= R:
        return R                                     # full dim: no divisibility constraint
    blk = -(-blk // 16) * 16                         # sublane aligned
    return R if blk >= R else blk


def distribution_for_entropy3(x, p_dec):
    """x: [B, C, H, W]; p_dec: [B, 2, C, H, W] -> likelihood [B, C, H, W]."""
    assert p_dec.ndim == 5 and p_dec.shape[1] == 2
    assert p_dec.shape[0] == x.shape[0] and p_dec.shape[2:] == x.shape[1:]

    orig_shape = x.shape
    B = x.shape[0]
    chw = math.prod(x.shape[1:])

    # Keep bf16 end-to-end if the caller already produces bf16 (HBM-bound v5e
    # lever: halves bytes).  Otherwise run the module's f32 interface.
    if x.dtype == jnp.bfloat16 and p_dec.dtype == jnp.bfloat16:
        io_dtype = jnp.bfloat16
    else:
        io_dtype = jnp.float32
    x = x.astype(io_dtype)
    p_dec = p_dec.astype(io_dtype)

    pad = (-chw) % _LANES
    if pad == 0:
        # Zero-copy path: contiguous reshapes only.
        x2 = x.reshape(B, chw)
        p3 = p_dec.reshape(B, 2, chw)
    else:
        # Rare fallback when C*H*W is not lane-aligned.
        x2 = jnp.pad(x.reshape(B, chw), ((0, 0), (0, pad)))
        p3 = jnp.pad(p_dec.reshape(B, 2, chw), ((0, 0), (0, 0), (0, pad)))
    padded = chw + pad
    R = padded // _LANES
    x3 = x2.reshape(B, R, _LANES)
    p4 = p3.reshape(B, 2, R, _LANES)

    row_blk = _pick_row_block(R, B)
    grid = (B, pl.cdiv(R, row_blk))

    x_spec = pl.BlockSpec((None, row_blk, _LANES), lambda b, j: (b, j, 0))
    p_spec = pl.BlockSpec((None, 2, row_blk, _LANES), lambda b, j: (b, 0, j, 0))
    o_spec = pl.BlockSpec((None, row_blk, _LANES), lambda b, j: (b, j, 0))

    out = pl.pallas_call(
        _entropy_kernel,
        out_shape=jax.ShapeDtypeStruct((B, R, _LANES), io_dtype),
        grid=grid,
        in_specs=[x_spec, p_spec],
        out_specs=o_spec,
        compiler_params=pltpu.CompilerParams(
            dimension_semantics=("parallel", "parallel")),
    )(x3, p4)

    if pad == 0:
        return out.reshape(orig_shape)
    return out.reshape(B, padded)[:, :chw].reshape(orig_shape)


def _reference(x, p_dec):
    """Pure-JAX reference using the exact lax.erf."""
    x = x.astype(jnp.float32)
    mean = p_dec[:, 0].astype(jnp.float32)
    scale = p_dec[:, 1].astype(jnp.float32)
    scale = jnp.where(scale == 0.0, 1e-9, scale)
    cdf = lambda v: 0.5 * (1.0 + lax.erf((v - mean) / (scale * jnp.sqrt(2.0))))
    like = jnp.abs(cdf(x + 0.5) - cdf(x - 0.5))
    return jnp.maximum(like, 1e-6)


if __name__ == "__main__":
    key = jax.random.PRNGKey(0)
    B, C, H, W = 2, 4, 16, 16
    k1, k2, k3 = jax.random.split(key, 3)

    x = jax.random.normal(k1, (B, C, H, W), dtype=jnp.float32) * 3.0
    mean = jax.random.normal(k2, (B, C, H, W), dtype=jnp.float32)
    # Positive scales, with a few exact zeros to exercise the scale==0 branch.
    scale = jnp.abs(jax.random.normal(k3, (B, C, H, W), dtype=jnp.float32)) + 0.1
    scale = scale.at[0, 0, 0, :4].set(0.0)
    p_dec = jnp.stack([mean, scale], axis=1)  # [B, 2, C, H, W]

    # f32 path (the module's interface).
    out = jax.block_until_ready(distribution_for_entropy3(x, p_dec))
    ref = _reference(x, p_dec)
    assert out.shape == (B, C, H, W)
    assert bool(jnp.all(jnp.isfinite(out)))
    # A&S-7.1.26 erf (|err|<=1.5e-7/call) + f32 rounding + Newton reciprocal
    # => likelihood matches the exact-erf f32 reference to a few 1e-6 absolute.
    assert jnp.allclose(out, ref, rtol=2e-4, atol=5e-6), "f32 mismatch vs reference"

    # bf16-at-boundary path (HBM lever for v5e): compare against the f32
    # reference evaluated on the same bf16-quantized inputs.
    xb = x.astype(jnp.bfloat16)
    pb = p_dec.astype(jnp.bfloat16)
    out_b = jax.block_until_ready(distribution_for_entropy3(xb, pb))
    ref_b = _reference(xb.astype(jnp.float32), pb.astype(jnp.float32))
    assert out_b.dtype == jnp.bfloat16 and out_b.shape == (B, C, H, W)
    assert jnp.allclose(out_b.astype(jnp.float32), ref_b, rtol=3e-2, atol=1e-2), \
        "bf16 mismatch vs reference"

    print("KERNEL_OK")
</pallas_src>

<mosaic_0001>
module attributes {stable_mosaic.version = 11 : i64} {
  func.func @_entropy_kernel(%arg0: i32, %arg1: i32, %arg2: memref<1x8x128xf32, #tpu.memory_space<vmem>>, %arg3: memref<1x2x8x128xf32, #tpu.memory_space<vmem>>, %arg4: memref<1x8x128xf32, #tpu.memory_space<vmem>>) attributes {dimension_semantics = [#tpu.dimension_semantics<parallel>, #tpu.dimension_semantics<parallel>], iteration_bounds = array<i64: 2, 1>, scalar_prefetch = 0 : i64, scratch_operands = 0 : i64, tpu.core_type = #tpu.core_type<tc>, window_params = [{transform_indices = @transform_0, window_bounds = array<i64: 1, 8, 128>}, {transform_indices = @transform_1, window_bounds = array<i64: 1, 2, 8, 128>}, {transform_indices = @transform_2, window_bounds = array<i64: 1, 8, 128>}]} {
    %c0 = arith.constant 0 : index
    %c0_0 = arith.constant 0 : index
    %c0_1 = arith.constant 0 : index
    %0 = vector.load %arg2[%c0, %c0_0, %c0_1] : memref<1x8x128xf32, #tpu.memory_space<vmem>>, vector<1x8x128xf32>
    %1 = vector.shape_cast %0 : vector<1x8x128xf32> to vector<8x128xf32>
    %c0_2 = arith.constant 0 : index
    %c0_3 = arith.constant 0 : index
    %c0_4 = arith.constant 0 : index
    %c0_5 = arith.constant 0 : index
    %2 = vector.load %arg3[%c0_2, %c0_3, %c0_4, %c0_5] : memref<1x2x8x128xf32, #tpu.memory_space<vmem>>, vector<1x1x8x128xf32>
    %3 = vector.shape_cast %2 : vector<1x1x8x128xf32> to vector<8x128xf32>
    %c0_6 = arith.constant 0 : index
    %c1 = arith.constant 1 : index
    %c0_7 = arith.constant 0 : index
    %c0_8 = arith.constant 0 : index
    %4 = vector.load %arg3[%c0_6, %c1, %c0_7, %c0_8] : memref<1x2x8x128xf32, #tpu.memory_space<vmem>>, vector<1x1x8x128xf32>
    %5 = vector.shape_cast %4 : vector<1x1x8x128xf32> to vector<8x128xf32>
    %cst = arith.constant 0.000000e+00 : f32
    %6 = vector.broadcast %cst : f32 to vector<8x128xf32>
    %7 = arith.cmpf oeq, %5, %6 : vector<8x128xf32>
    %cst_9 = arith.constant 9.99999971E-10 : f32
    %8 = vector.broadcast %cst_9 : f32 to vector<8x128xf32>
    %9 = arith.select %7, %8, %5 : vector<8x128xi1>, vector<8x128xf32>
    %cst_10 = arith.constant 1.41421354 : f32
    %10 = vector.broadcast %cst_10 : f32 to vector<8x128xf32>
    %11 = arith.mulf %9, %10 : vector<8x128xf32>
    %12 = tpu.reciprocal %11 {approx = true} : vector<8x128xf32> -> vector<8x128xf32>
    %13 = arith.mulf %11, %12 : vector<8x128xf32>
    %cst_11 = arith.constant 2.000000e+00 : f32
    %14 = vector.broadcast %cst_11 : f32 to vector<8x128xf32>
    %15 = arith.subf %14, %13 : vector<8x128xf32>
    %16 = arith.mulf %12, %15 : vector<8x128xf32>
    %17 = arith.subf %1, %3 : vector<8x128xf32>
    %18 = arith.mulf %17, %16 : vector<8x128xf32>
    %cst_12 = arith.constant 5.000000e-01 : f32
    %19 = vector.broadcast %cst_12 : f32 to vector<8x128xf32>
    %20 = arith.mulf %19, %16 : vector<8x128xf32>
    %21 = arith.addf %18, %20 : vector<8x128xf32>
    %22 = math.absf %21 : vector<8x128xf32>
    %cst_13 = arith.constant 0.327591091 : f32
    %23 = vector.broadcast %cst_13 : f32 to vector<8x128xf32>
    %24 = arith.mulf %23, %22 : vector<8x128xf32>
    %cst_14 = arith.constant 1.000000e+00 : f32
    %25 = vector.broadcast %cst_14 : f32 to vector<8x128xf32>
    %26 = arith.addf %25, %24 : vector<8x128xf32>
    %27 = tpu.reciprocal %26 {approx = true} : vector<8x128xf32> -> vector<8x128xf32>
    %28 = arith.mulf %26, %27 : vector<8x128xf32>
    %cst_15 = arith.constant 2.000000e+00 : f32
    %29 = vector.broadcast %cst_15 : f32 to vector<8x128xf32>
    %30 = arith.subf %29, %28 : vector<8x128xf32>
    %31 = arith.mulf %27, %30 : vector<8x128xf32>
    %cst_16 = arith.constant 1.06140542 : f32
    %32 = vector.broadcast %cst_16 : f32 to vector<8x128xf32>
    %33 = arith.mulf %31, %32 : vector<8x128xf32>
    %cst_17 = arith.constant -1.45315206 : f32
    %34 = vector.broadcast %cst_17 : f32 to vector<8x128xf32>
    %35 = arith.addf %34, %33 : vector<8x128xf32>
    %36 = arith.mulf %31, %35 : vector<8x128xf32>
    %cst_18 = arith.constant 1.42141378 : f32
    %37 = vector.broadcast %cst_18 : f32 to vector<8x128xf32>
    %38 = arith.addf %37, %36 : vector<8x128xf32>
    %39 = arith.mulf %31, %38 : vector<8x128xf32>
    %cst_19 = arith.constant -0.284496725 : f32
    %40 = vector.broadcast %cst_19 : f32 to vector<8x128xf32>
    %41 = arith.addf %40, %39 : vector<8x128xf32>
    %42 = arith.mulf %31, %41 : vector<8x128xf32>
    %cst_20 = arith.constant 0.254829586 : f32
    %43 = vector.broadcast %cst_20 : f32 to vector<8x128xf32>
    %44 = arith.addf %43, %42 : vector<8x128xf32>
    %45 = arith.mulf %44, %31 : vector<8x128xf32>
    %46 = arith.mulf %22, %22 : vector<8x128xf32>
    %cst_21 = arith.constant 0.000000e+00 : f32
    %47 = vector.broadcast %cst_21 : f32 to vector<8x128xf32>
    %48 = arith.subf %47, %46 : vector<8x128xf32>
    %49 = math.exp %48 : vector<8x128xf32>
    %50 = arith.mulf %45, %49 : vector<8x128xf32>
    %cst_22 = arith.constant 1.000000e+00 : f32
    %51 = vector.broadcast %cst_22 : f32 to vector<8x128xf32>
    %52 = arith.subf %51, %50 : vector<8x128xf32>
    %cst_23 = arith.constant 0.000000e+00 : f32
    %53 = vector.broadcast %cst_23 : f32 to vector<8x128xf32>
    %54 = arith.cmpf olt, %21, %53 : vector<8x128xf32>
    %cst_24 = arith.constant 0.000000e+00 : f32
    %55 = vector.broadcast %cst_24 : f32 to vector<8x128xf32>
    %56 = arith.subf %55, %52 : vector<8x128xf32>
    %57 = arith.select %54, %56, %52 : vector<8x128xi1>, vector<8x128xf32>
    %58 = arith.subf %18, %20 : vector<8x128xf32>
    %59 = math.absf %58 : vector<8x128xf32>
    %cst_25 = arith.constant 0.327591091 : f32
    %60 = vector.broadcast %cst_25 : f32 to vector<8x128xf32>
    %61 = arith.mulf %60, %59 : vector<8x128xf32>
    %cst_26 = arith.constant 1.000000e+00 : f32
    %62 = vector.broadcast %cst_26 : f32 to vector<8x128xf32>
    %63 = arith.addf %62, %61 : vector<8x128xf32>
    %64 = tpu.reciprocal %63 {approx = true} : vector<8x128xf32> -> vector<8x128xf32>
    %65 = arith.mulf %63, %64 : vector<8x128xf32>
    %cst_27 = arith.constant 2.000000e+00 : f32
    %66 = vector.broadcast %cst_27 : f32 to vector<8x128xf32>
    %67 = arith.subf %66, %65 : vector<8x128xf32>
    %68 = arith.mulf %64, %67 : vector<8x128xf32>
    %cst_28 = arith.constant 1.06140542 : f32
    %69 = vector.broadcast %cst_28 : f32 to vector<8x128xf32>
    %70 = arith.mulf %68, %69 : vector<8x128xf32>
    %cst_29 = arith.constant -1.45315206 : f32
    %71 = vector.broadcast %cst_29 : f32 to vector<8x128xf32>
    %72 = arith.addf %71, %70 : vector<8x128xf32>
    %73 = arith.mulf %68, %72 : vector<8x128xf32>
    %cst_30 = arith.constant 1.42141378 : f32
    %74 = vector.broadcast %cst_30 : f32 to vector<8x128xf32>
    %75 = arith.addf %74, %73 : vector<8x128xf32>
    %76 = arith.mulf %68, %75 : vector<8x128xf32>
    %cst_31 = arith.constant -0.284496725 : f32
    %77 = vector.broadcast %cst_31 : f32 to vector<8x128xf32>
    %78 = arith.addf %77, %76 : vector<8x128xf32>
    %79 = arith.mulf %68, %78 : vector<8x128xf32>
    %cst_32 = arith.constant 0.254829586 : f32
    %80 = vector.broadcast %cst_32 : f32 to vector<8x128xf32>
    %81 = arith.addf %80, %79 : vector<8x128xf32>
    %82 = arith.mulf %81, %68 : vector<8x128xf32>
    %83 = arith.mulf %59, %59 : vector<8x128xf32>
    %cst_33 = arith.constant 0.000000e+00 : f32
    %84 = vector.broadcast %cst_33 : f32 to vector<8x128xf32>
    %85 = arith.subf %84, %83 : vector<8x128xf32>
    %86 = math.exp %85 : vector<8x128xf32>
    %87 = arith.mulf %82, %86 : vector<8x128xf32>
    %cst_34 = arith.constant 1.000000e+00 : f32
    %88 = vector.broadcast %cst_34 : f32 to vector<8x128xf32>
    %89 = arith.subf %88, %87 : vector<8x128xf32>
    %cst_35 = arith.constant 0.000000e+00 : f32
    %90 = vector.broadcast %cst_35 : f32 to vector<8x128xf32>
    %91 = arith.cmpf olt, %58, %90 : vector<8x128xf32>
    %cst_36 = arith.constant 0.000000e+00 : f32
    %92 = vector.broadcast %cst_36 : f32 to vector<8x128xf32>
    %93 = arith.subf %92, %89 : vector<8x128xf32>
    %94 = arith.select %91, %93, %89 : vector<8x128xi1>, vector<8x128xf32>
    %95 = arith.subf %57, %94 : vector<8x128xf32>
    %96 = math.absf %95 : vector<8x128xf32>
    %cst_37 = arith.constant 5.000000e-01 : f32
    %97 = vector.broadcast %cst_37 : f32 to vector<8x128xf32>
    %98 = arith.mulf %97, %96 : vector<8x128xf32>
    %cst_38 = arith.constant 9.99999997E-7 : f32
    %99 = vector.broadcast %cst_38 : f32 to vector<8x128xf32>
    %100 = arith.maximumf %98, %99 : vector<8x128xf32>
    %c0_39 = arith.constant 0 : index
    %c0_40 = arith.constant 0 : index
    %c0_41 = arith.constant 0 : index
    %101 = vector.load %arg4[%c0_39, %c0_40, %c0_41] : memref<1x8x128xf32, #tpu.memory_space<vmem>>, vector<1x8x128xf32>
    %102 = vector.shape_cast %101 : vector<1x8x128xf32> to vector<8x128xf32>
    %103 = vector.shape_cast %100 : vector<8x128xf32> to vector<1x8x128xf32>
    tpu.vector_store %arg4[%c0_39, %c0_40, %c0_41], %103 {strides = array<i32>} : memref<1x8x128xf32, #tpu.memory_space<vmem>>, vector<1x8x128xf32>,
    return
  }
  func.func @transform_0(%arg0: i32, %arg1: i32) -> (i32, i32, i32) {
    %c0_i32 = arith.constant 0 : i32
    %c0_i32_0 = arith.constant 0 : i32
    return %arg0, %arg1, %c0_i32 : i32, i32, i32
  }
  func.func @transform_1(%arg0: i32, %arg1: i32) -> (i32, i32, i32, i32) {
    %c0_i32 = arith.constant 0 : i32
    %c0_i32_0 = arith.constant 0 : i32
    %c0_i32_1 = arith.constant 0 : i32
    return %arg0, %c0_i32, %arg1, %c0_i32_0 : i32, i32, i32, i32
  }
  func.func @transform_2(%arg0: i32, %arg1: i32) -> (i32, i32, i32) {
    %c0_i32 = arith.constant 0 : i32
    %c0_i32_0 = arith.constant 0 : i32
    return %arg0, %arg1, %c0_i32 : i32, i32, i32
  }
}

</mosaic_0001>

<bundles_post_ra>
// kernel: tpu_custom_call.1
= control target key start
LH: loop header
LB: loop body
LE: loop exit
PB: predicated region body
PF: predicated region fallthrough
CT: control target
= control target key end

     0   :  { %7 = vsyncpa [#allocation3], 0  ;;  %s903_s0 = inlined_call_operand.hbm [shape: f32[2,8,128], index: 0, kind: input, shape index: {}]   ;;  %s904_s1 = inlined_call_operand.hbm [shape: f32[2,2,8,128], index: 1, kind: input, shape index: {}]   ;;  %s905_s2 = inlined_call_operand.hbm [shape: f32[2,8,128], index: 2, kind: output, shape index: {}]  }
   0x1   :  { %9 = vsyncpa [#allocation3 + $0x1], 0 }
   0x2   :  { %10 = vsyncpa [#allocation6], 0 }
   0x3   :  { %12 = vsyncpa [#allocation6 + $0x1], 0 }
   0x4   :  { %13 = vsyncpa [#allocation4], 0 }
   0x5   :  { %15 = vsyncpa [#allocation4 + $0x1], 0  ;;  %s676_s9 = smov 0   ;;  %s678_s10 = smov 0  }
   0x6   :  { %s680_s11 = smov 0   ;;  %s682_s12 = smov 0  }
   0x7   :  { %s684_s13 = smov 0   ;;  %s686_s14 = smov 0  }
   0x8 LB: > { %s410_s15 = sadd.s32 4294967295, %s654_s14   ;;  %s411_s16 = sadd.s32 4294967294, %s654_s14   ;;  %s654_s14 = sphi %s686_s14, %s21_s14   ;;  %s650_s13 = sphi %s684_s13, %s924_s13   ;;  %s646_s12 = sphi %s682_s12, %s923_s12   ;;  %s642_s11 = sphi %s680_s11, %s922_s11   ;;  %s638_s10 = sphi %s678_s10, %s921_s10   ;;  %s634_s9 = sphi %s676_s9, %s920_s9  }
   0x9   : > { %s33_s17 = sadd.s32 1, %s650_s13  ;;  %s42_s18 = sadd.s32 1, %s642_s11 }
   0xa   : > { %p35_p0 = scmp.ge.s32.totalorder %s33_s17, 2  ;;  %p49_p1 = scmp.ne.s32.totalorder %s642_s11, %s638_s10 }
   0xb   : > { %p50_p2 = scmp.eq.s32.totalorder %s654_s14, 0  ;;  %p55_p3 = scmp.ne.s32.totalorder %s638_s10, %s634_s9 }
   0xc   : > { %s926_s17 = smov (%p35_p0, %s33_s17), 0  ;;  %p56_p5 = scmp.eq.s32.totalorder %s410_s15, 0 }
   0xd   : > { %p717_p4 = por %p50_p2, %p49_p1  ;;  %s37_s20 = ssub.s32 %s650_s13, %s926_s17 }
   0xe   : > { %p109_p6 = scmp.eq.s32.totalorder %s410_s15, 1  ;;  %p40_p7 = scmp.eq.s32.totalorder %s37_s20, 0 }
   0xf   : > { %p723_p8 = por %p56_p5, %p55_p3  ;;  %p115_p10 = scmp.eq.s32.totalorder %s411_s16, 1 }
  0x10   : > { %p727_p9 = por %p109_p6, %p49_p1  ;;  %p446_p13 = scmp.lt.s32.totalorder %s654_s14, 2 }
  0x11   : > { %s909_s21 = scalar_select %p723_p8, 1, 0 }
  0x12   : > { %s910_s22 = scalar_select %p727_p9, 1, 0 }
  0x13   : > { %s732_s23 = scalar_select %p40_p7, %s642_s11, %s42_s18  }
  0x14   : > { %p734_p11 = por %p115_p10, %p55_p3  ;;  %s741_s25 = sand.u32 1, %s642_s11  }
  0x15   : > { %s414_s26 = sshll.u32 %s741_s25, 3  ;;  %s415_s27 = sshll.u32 %s650_s13, 7 }
  0x16   : > { %s911_s24 = scalar_select %p734_p11, 1, 0 }
  0x17   : > { %s748_s30 = scalar_lea.hbm %s903_s0, %s415_s27  ;;  %s139_s3 = scalar_lea.vmem [#allocation2], %s414_s26 }
  0x18   : > { %s147_s4 = sshll.u32 %s139_s3, 4  ;;  %p754_p0 = pnand %p446_p13, %p717_p4  ;;  %s750_s4 = int_to_ptr.vmem [resolvable:$true] %s147_s4 }
  0x19   : > { %s136_s6 = scalar_lea.sflag [#allocation3], %s741_s25  ;;  %s508_s7 = scalar_lea.hbm %s748_s30, 128 }
  0x1a   : > { %p509_p3 = scmp.ne.s32.totalorder %s748_s30, %s508_s7  ;;  %p510_p5 = pneg %p754_p0 }
  0x1b   : > { %s513_s16 = scalar_lea.hbm %s903_s0, 256  ;;  %p514_p4 = scmp.lt.u32.totalorder %s748_s30, %s903_s0 }
  0x1c   : > { %p511_p6 = pnand %p510_p5, %p509_p3  ;;  %p515_p10 = scmp.lt.u32.totalorder %s513_s16, %s508_s7 }
  0x1d   : > { %p517_p12 = scmp.lt.u32.totalorder %s508_s7, %s748_s30 }
  0x1e   : > { %p512_p7 = pneg %p511_p6  ;;  %p516_p13 = por %p515_p10, %p514_p4 }
  0x20   : > { %p518_p1 = por %p517_p12, %p516_p13 }
  0x22   : > { %p519_p2 = pnand %p518_p1, %p512_p7 }
  0x24   : > { %522 = shalt.err (!%p519_p2)
}
  0x25   : > { %s523_s20 = scalar_lea.vmem %s750_s4, 128  ;;  %s656_s26 = smov [#allocation2]  }
  0x26   : > { %p524_p3 = scmp.ne.s32.totalorder %s750_s4, %s523_s20  ;;  %s528_s27 = sshll.u32 %s656_s26, 4  ;;  %s529_s27 = int_to_ptr.vmem [resolvable:$false] %s528_s27 }
  0x27   : > { %s530_s28 = scalar_lea.vmem %s529_s27, 256  ;;  %p531_p9 = scmp.lt.s32.totalorder %s750_s4, %s529_s27 }
  0x28   : > { %p526_p6 = pnand %p524_p3, %p510_p5  ;;  %p532_p4 = scmp.lt.s32.totalorder %s530_s28, %s523_s20 }
  0x2a   : > { %p527_p11 = pneg %p526_p6  ;;  %p533_p10 = por %p532_p4, %p531_p9 }
  0x2c   : > { %p534_p12 = pnand %p533_p10, %p527_p11 }
  0x2e   : > { %537 = shalt.err (!%p534_p12)
}
  0x2f   : > { %438 = dma.hbm_to_vmem [thread:$0]  (!%p754_p0), %s748_s30, 128, %s750_s4, %s136_s6  }
  0x30   : > { %p913_p1 = scmp.lt.s32.totalorder %s654_s14, 3  ;;  %p914_p2 = scmp.ge.s32.totalorder %s654_s14, 1 }
  0x31   : > { %s416_s3 = sshll.u32 %s741_s25, 4  ;;  %s428_s7 = sshll.u32 %s650_s13, 8 }
  0x32   : > { %p790_p7 = pnand %p914_p2, %p913_p1  ;;  %s799_s16 = scalar_lea.hbm %s904_s1, %s428_s7 }
  0x33   : > { %s158_s18 = scalar_lea.vmem [#allocation5], %s416_s3  ;;  %s155_s30 = scalar_lea.sflag [#allocation6], %s741_s25 }
  0x34   : > { %s166_s19 = sshll.u32 %s158_s18, 4  ;;  %s538_s4 = scalar_lea.hbm %s799_s16, 256  ;;  %s801_s19 = int_to_ptr.vmem [resolvable:$true] %s166_s19 }
  0x35   : > { %p539_p9 = scmp.ne.s32.totalorder %s799_s16, %s538_s4  ;;  %s543_s26 = scalar_lea.hbm %s904_s1, 512 }
  0x36   : > { %p544_p3 = scmp.lt.u32.totalorder %s799_s16, %s904_s1  ;;  %p545_p6 = scmp.lt.u32.totalorder %s543_s26, %s538_s4 }
  0x37   : > { %p541_p11 = pnand %p539_p9, %p510_p5  ;;  %p547_p10 = scmp.lt.u32.totalorder %s538_s4, %s799_s16 }
  0x38   : > { %p546_p4 = por %p545_p6, %p544_p3 }
  0x39   : > { %p542_p13 = pneg %p541_p11 }
  0x3a   : > { %p548_p12 = por %p547_p10, %p546_p4 }
  0x3c   : > { %p549_p1 = pnand %p548_p12, %p542_p13 }
  0x3e   : > { %552 = shalt.err (!%p549_p1)
}
  0x3f   : > { %s553_s3 = scalar_lea.vmem %s801_s19, 256  ;;  %s657_s7 = smov [#allocation5]  }
  0x40   : > { %p554_p2 = scmp.ne.s32.totalorder %s801_s19, %s553_s3  ;;  %s558_s8 = sshll.u32 %s657_s7, 4  ;;  %s559_s8 = int_to_ptr.vmem [resolvable:$false] %s558_s8 }
  0x41   : > { %s560_s15 = scalar_lea.vmem %s559_s8, 512  ;;  %p561_p8 = scmp.lt.s32.totalorder %s801_s19, %s559_s8 }
  0x42   : > { %p556_p9 = pnand %p554_p2, %p510_p5  ;;  %p562_p3 = scmp.lt.s32.totalorder %s560_s15, %s553_s3 }
  0x44   : > { %p557_p11 = pneg %p556_p9  ;;  %p563_p6 = por %p562_p3, %p561_p8 }
  0x46   : > { %p564_p4 = pnand %p563_p6, %p557_p11 }
  0x48   : > { %567 = shalt.err (!%p564_p4)
}
  0x49   : > { %s658_s18 = smov 128   ;;  %s659_s4 = smov 8  }
  0x4a   : > { %441 = dma.hbm_to_vmem [thread:$0]  (!%p754_p0), %s799_s16, 256, %s801_s19, %s155_s30, %s658_s18, %s658_s18, %s659_s4  }
  0x4b   : > { %178 = sbr.rel (%p790_p7) target bundleno = 183 (0xb7), region = 28  ;;  %s832_s6 = sand.u32 (!%p790_p7), 1, %s638_s10  }
  0x4c   : > { %s420_s20 = sshll.u32 (!%p790_p7), %s832_s6, 3  ;;  %s181_s26 = scalar_lea.sflag (!%p790_p7), [#allocation3], %s832_s6 }
  0x4d   : > { %s184_s27 = scalar_lea.vmem (!%p790_p7), [#allocation2], %s420_s20  ;;  %p916_p8 = scmp.ne.s32.totalorder (!%p790_p7), %s909_s21, 0 }
  0x52   : > { %621 = dma.done.wait (%p916_p8), %s181_s26, 128  }
  0x53   : > { %623 = vsyncadd (%p916_p8), %s181_s26, 4294967168  ;;  %s421_s25 = sshll.u32 %s832_s6, 4  ;;  %s190_s5 = scalar_lea.sflag [#allocation6], %s832_s6 }
  0x54   : > { %s193_s29 = scalar_lea.vmem [#allocation5], %s421_s25 }
  0x55   : > { %625 = dma.done.wait (%p916_p8), %s190_s5, 256  }
  0x56   : > { %627 = vsyncadd (%p916_p8), %s190_s5, 4294967040  ;;  %v423_v0 = vld [vmem:[%s193_s29 + $0x8] sm:$0xff]  ;;  %v220_v5 = vld [vmem:[%s193_s29] sm:$0xff]  ;;  %s218_s21 = scalar_lea.vmem [#allocation7], %s420_s20  ;;  %s425_s19 = sshll.u32 %s646_s12, 7 }
  0x57   : > { %vm223_vm0 = vcmp.eq.f32.partialorder %v423_v0, 0.0  ;;  %v219_v4 = vld [vmem:[%s184_s27] sm:$0xff]  ;;  %s305_s16 = sshll.u32 %s218_s21, 4  ;;  %s856_s3 = scalar_lea.hbm %s905_s2, %s425_s19  ;;  %s851_s16 = int_to_ptr.vmem [resolvable:$true] %s305_s16 }
  0x58   : > { %v224_v1 = vsel %vm223_vm0, 1e-09, %v423_v0  ;;  %v230_v8 = vsub.f32 %v219_v4, %v220_v5  ;;  %s291_s7 = scalar_lea.sflag [#allocation4], %s832_s6  ;;  %s568_s8 = scalar_lea.vmem %s851_s16, 128 }
  0x59   : > { %v225_v2 = vmul.f32 1.4142135, %v224_v1  ;;  %p569_p0 = scmp.ne.s32.totalorder %s851_s16, %s568_s8  ;;  %p917_p5 = scmp.ne.s32.totalorder %s910_s22, 0 }
  0x5a   : > { %s660_s12 = smov [#allocation7]  }
  0x5b   : > { %498 = vrcp.f32 %v225_v2  ;;  %p570_p7 = pnand %p569_p0, %p917_p5  ;;  %s572_s15 = sshll.u32 %s660_s12, 4  ;;  %s573_s15 = int_to_ptr.vmem [resolvable:$false] %s572_s15 }
  0x5c   : > { %s574_s18 = scalar_lea.vmem %s573_s15, 256  ;;  %p575_p10 = scmp.lt.s32.totalorder %s851_s16, %s573_s15 }
  0x5d   : > { %p571_p13 = pneg %p570_p7  ;;  %p576_p12 = scmp.lt.s32.totalorder %s574_s18, %s568_s8 }
  0x5f   : > { %p577_p1 = por %p576_p12, %p575_p10 }
  0x61   : > { %p578_p2 = pnand %p577_p1, %p571_p13 }
  0x65   : > { %v499_v3 = vpop.eup %498 }
  0x66   : > { %v227_v6 = vmul.f32 %v499_v3, %v225_v2 }
  0x68   : > { %v228_v7 = vsub.f32 2.0, %v227_v6 }
  0x6a   : > { %v229_v9 = vmul.f32 %v499_v3, %v228_v7 }
  0x6c   : > { %v231_v10 = vmul.f32 %v230_v8, %v229_v9  ;;  %v232_v11 = vmul.f32 0.5, %v229_v9 }
  0x6e   : > { %v233_v12 = vadd.f32 %v232_v11, %v231_v10  ;;  %v259_v13 = vsub.f32 %v231_v10, %v232_v11 }
  0x70   : > { %v234_v14 = vand.u32 2147483647, %v233_v12  ;;  %v260_v15 = vand.u32 2147483647, %v259_v13  ;;  %vm256_vm1 = vcmp.lt.f32.partialorder %v233_v12, 0.0  ;;  %vm282_vm2 = vcmp.lt.f32.partialorder %v259_v13, 0.0 }
  0x72   : > { %v235_v16 = vmul.f32 0.3275911, %v234_v14  ;;  %v261_v17 = vmul.f32 0.3275911, %v260_v15  ;;  %v250_v21 = vmul.f32 %v234_v14, %v234_v14  ;;  %v276_v24 = vmul.f32 %v260_v15, %v260_v15 }
  0x74   : > { %v236_v18 = vadd.f32 1.0, %v235_v16  ;;  %v262_v19 = vadd.f32 1.0, %v261_v17  ;;  %v251_v27 = vsub.f32 0.0, %v250_v21  ;;  %v277_v30 = vsub.f32 0.0, %v276_v24 }
  0x76   : > { %500 = vrcp.f32 %v236_v18  ;;  %v252_v33 = vmul.f32 1.442695, %v251_v27  ;;  %v278_v36 = vmul.f32 1.442695, %v277_v30 }
  0x77   : > { %502 = vrcp.f32 %v262_v19 }
  0x78   : > { %504 = vpow2.f32 %v252_v33 }
  0x79   : > { %506 = vpow2.f32 %v278_v36 }
  0x80   : > { %v501_v20 = vpop.eup %500 }
  0x81   : > { %v503_v22 = vpop.eup %502  ;;  %v238_v23 = vmul.f32 %v501_v20, %v236_v18 }
  0x82   : > { %v264_v25 = vmul.f32 %v503_v22, %v262_v19  ;;  %v505_v49 = vpop.eup %504 }
  0x83   : > { %v239_v26 = vsub.f32 2.0, %v238_v23  ;;  %v507_v51 = vpop.eup %506 }
  0x84   : > { %v265_v28 = vsub.f32 2.0, %v264_v25 }
  0x85   : > { %v240_v29 = vmul.f32 %v501_v20, %v239_v26 }
  0x86   : > { %v266_v31 = vmul.f32 %v503_v22, %v265_v28 }
  0x87   : > { %v241_v32 = vmul.f32 1.0614054, %v240_v29 }
  0x88   : > { %v267_v34 = vmul.f32 1.0614054, %v266_v31 }
  0x89   : > { %v242_v35 = vadd.f32 -1.4531521, %v241_v32 }
  0x8a   : > { %v268_v37 = vadd.f32 -1.4531521, %v267_v34 }
  0x8b   : > { %v243_v38 = vmul.f32 %v242_v35, %v240_v29 }
  0x8c   : > { %v269_v39 = vmul.f32 %v268_v37, %v266_v31 }
  0x8d   : > { %v244_v40 = vadd.f32 1.4214138, %v243_v38 }
  0x8e   : > { %v270_v41 = vadd.f32 1.4214138, %v269_v39 }
  0x8f   : > { %v245_v42 = vmul.f32 %v244_v40, %v240_v29 }
  0x90   : > { %v271_v43 = vmul.f32 %v270_v41, %v266_v31 }
  0x91   : > { %v246_v44 = vadd.f32 -0.28449672, %v245_v42 }
  0x92   : > { %v272_v45 = vadd.f32 -0.28449672, %v271_v43 }
  0x93   : > { %v247_v46 = vmul.f32 %v246_v44, %v240_v29 }
  0x94   : > { %v273_v47 = vmul.f32 %v272_v45, %v266_v31 }
  0x95   : > { %v248_v48 = vadd.f32 0.2548296, %v247_v46 }
  0x96   : > { %v274_v50 = vadd.f32 0.2548296, %v273_v47 }
  0x97   : > { %v249_v52 = vmul.f32 %v248_v48, %v240_v29 }
  0x98   : > { %v275_v53 = vmul.f32 %v274_v50, %v266_v31 }
  0x99   : > { %v254_v54 = vmul.f32 %v505_v49, %v249_v52 }
  0x9a   : > { %v280_v55 = vmul.f32 %v507_v51, %v275_v53 }
  0x9b   : > { %v255_v56 = vsub.f32 1.0, %v254_v54 }
  0x9c   : > { %v281_v57 = vsub.f32 1.0, %v280_v55 }
  0x9d   : > { %v257_v58 = vsub.f32 0.0, %v255_v56 }
  0x9e   : > { %v283_v59 = vsub.f32 0.0, %v281_v57 }
  0x9f   : > { %v258_v60 = vsel %vm256_vm1, %v257_v58, %v255_v56 }
  0xa0   : > { %v284_v61 = vsel %vm282_vm2, %v283_v59, %v281_v57 }
  0xa1   : > { %v285_v62 = vsub.f32 %v258_v60, %v284_v61 }
  0xa3   : > { %v286_v63 = vand.u32 2147483647, %v285_v62 }
  0xa5   : > { %v287_v0 = vmul.f32 0.5, %v286_v63 }
  0xa7   : > { %v288_v1 = vmax.f32 %v287_v0, 1e-06 }
  0xa9   : > { %289 = vst [vmem:[%s218_s21] sm:$0xff] %v288_v1 }
  0xaa   : > { %581 = shalt.err (!%p578_p2)
}
  0xab   : > { %s582_s4 = scalar_lea.hbm %s856_s3, 128  ;;  %s586_s26 = scalar_lea.hbm %s905_s2, 256 }
  0xac   : > { %p583_p9 = scmp.ne.s32.totalorder %s856_s3, %s582_s4  ;;  %p587_p6 = scmp.lt.u32.totalorder %s856_s3, %s905_s2 }
  0xad   : > { %p588_p4 = scmp.lt.u32.totalorder %s586_s26, %s582_s4  ;;  %p590_p0 = scmp.lt.u32.totalorder %s582_s4, %s856_s3 }
  0xae   : > { %p584_p11 = pnand %p583_p9, %p917_p5 }
  0xaf   : > { %p589_p8 = por %p588_p4, %p587_p6 }
  0xb0   : > { %p585_p3 = pneg %p584_p11 }
  0xb1   : > { %p591_p7 = por %p590_p0, %p589_p8 }
  0xb3   : > { %p592_p13 = pnand %p591_p7, %p585_p3 }
  0xb5   : > { %595 = shalt.err (!%p592_p13)
}
  0xb6   : > { %433 = dma.vmem_to_hbm [thread:$0]  (%p917_p5), %s851_s16, 128, %s856_s3, %s291_s7  }
  0xb7 PF: > { %s317_s5 = sand.u32 1, %s634_s9   ;;  %p918_p10 = scmp.ne.s32.totalorder %s911_s24, 0 }
  0xb8   : > { %p919_p12 = scmp.ge.s32.totalorder %s654_s14, 2  ;;  %s318_s29 = scalar_lea.sflag [#allocation4], %s317_s5 }
  0xba   : > { %p443_p1 = pnand %p919_p12, %p918_p10 }
  0xbc   : > { %629 = dma.done.wait (!%p443_p1), %s318_s29, 128  }
  0xbd   : > { %631 = vsyncadd (!%p443_p1), %s318_s29, 4294967168  ;;  %s21_s14 = sadd.s32 1, %s654_s14   ;;  %s920_s9 = smov %s638_s10 }
  0xbe   : > { %p18_p2 = scmp.ge.s32.totalorder %s21_s14, 4   ;;  %s921_s10 = smov %s642_s11 }
  0xbf   : > { %s922_s11 = smov %s732_s23  ;;  %s923_s12 = smov %s650_s13 }
  0xc0   : > { %s924_s13 = smov %s926_s17  ;;  %20 = sbr.rel (!%p18_p2) target bundleno = 8 (0x8), region = 87 }
  0xc7   :  { %323 = vsyncpa [#allocation3], 1 }
  0xc8   :  { %325 = vsyncpa [#allocation3 + $0x1], 1 }
  0xc9   :  { %326 = vsyncpa [#allocation6], 1 }
  0xca   :  { %328 = vsyncpa [#allocation6 + $0x1], 1 }
  0xcb   :  { %329 = vsyncpa [#allocation4], 1 }
  0xcc   :  { %331 = vsyncpa [#allocation4 + $0x1], 1 }

</bundles_post_ra>
